<compile_context>
chip_gen: v7x
topology: tpu7x:2x2x1
jax: 0.10.0
libtpu: 0.0.40
codegen_flags: <defaults>
</compile_context>

<pallas_src>
import jax
import jax.numpy as jnp
from jax.experimental import pallas as pl
from jax.experimental.pallas import tpu as pltpu


IN_FEATURES = 2000     # flattened input features (Linear(2000, 112))
HIDDEN = 112
HIDDEN_PAD = 128       # hidden padded to a full 128-lane vreg
LATENT_PAD = 128       # latent padded to a full 128-lane vreg (sliced in wrapper)
DEFAULT_TB = 512       # batch tile: safe for v5e/v6e/v7x scoped-VMEM budgets


def encoder_kernel(x_ref, w1_ref, b1_ref, w2_ref, b2_ref, o_ref):
    # x tile: (TB, 2000) in the compute dtype (bf16 or f32); weights resident.
    x = x_ref[...]
    # Layer 1: MXU matmul with f32 accumulation; bias + ReLU in f32 on the VPU.
    h = jnp.dot(x, w1_ref[...], preferred_element_type=jnp.float32)
    h = jnp.maximum(h + b1_ref[...], 0.0)
    # Layer 2: back to compute dtype for the MXU, f32 accumulation, f32 bias.
    z = jnp.dot(h.astype(w2_ref.dtype), w2_ref[...],
                preferred_element_type=jnp.float32)
    o_ref[...] = (z + b2_ref[...]).astype(o_ref.dtype)


def prepare_params(w1, b1, w2, b2, *, use_bf16=True):
    """Pad params to lane-dense shapes and cast weights to the compute dtype.

    Done once, outside the per-call hot path.  Returns (params, latent_dims).
    """
    assert w1.shape == (IN_FEATURES, HIDDEN), w1.shape
    latent = w2.shape[1]
    assert w2.shape[0] == HIDDEN and latent <= LATENT_PAD, w2.shape
    cdt = jnp.bfloat16 if use_bf16 else jnp.float32

    w1p = jnp.zeros((IN_FEATURES, HIDDEN_PAD), jnp.float32).at[:, :HIDDEN].set(w1)
    b1p = jnp.zeros((1, HIDDEN_PAD), jnp.float32).at[:, :HIDDEN].set(
        b1.reshape(1, -1))
    w2p = jnp.zeros((HIDDEN_PAD, LATENT_PAD), jnp.float32).at[:HIDDEN, :latent].set(w2)
    b2p = jnp.zeros((1, LATENT_PAD), jnp.float32).at[:, :latent].set(
        b2.reshape(1, -1))
    return (w1p.astype(cdt), b1p, w2p.astype(cdt), b2p), latent


def encoder_forward(x, params, latent, *, tb=DEFAULT_TB):
    """x: (B, ...) flattened to (B, 2000). Returns (B, latent) float32."""
    w1p, b1p, w2p, b2p = params
    compute_dtype = w1p.dtype

    B = x.shape[0]
    x2d = x.reshape(B, -1)
    assert x2d.shape[1] == IN_FEATURES, f"expected {IN_FEATURES} flat features"

    # Batch tiling: a single full-batch tile if B is small, else TB-row tiles
    # (pad B up to a multiple of TB so the grid divides evenly).
    if B <= tb:
        TB, Bp = B, B
    else:
        TB = tb
        Bp = pl.cdiv(B, TB) * TB
    if Bp != B:
        x2d = jnp.pad(x2d, ((0, Bp - B), (0, 0)))
    x_in = x2d.astype(compute_dtype)

    out = pl.pallas_call(
        encoder_kernel,
        out_shape=jax.ShapeDtypeStruct((Bp, LATENT_PAD), jnp.float32),
        grid_spec=pl.GridSpec(
            grid=(Bp // TB,),
            in_specs=[
                # x: tiled along batch -> double-buffered / pipelined.
                pl.BlockSpec((TB, IN_FEATURES), lambda i: (i, 0)),
                # Weights/biases: constant block index -> fetched once, resident.
                pl.BlockSpec((IN_FEATURES, HIDDEN_PAD), lambda i: (0, 0)),
                pl.BlockSpec((1, HIDDEN_PAD), lambda i: (0, 0)),
                pl.BlockSpec((HIDDEN_PAD, LATENT_PAD), lambda i: (0, 0)),
                pl.BlockSpec((1, LATENT_PAD), lambda i: (0, 0)),
            ],
            out_specs=pl.BlockSpec((TB, LATENT_PAD), lambda i: (i, 0)),
        ),
        compiler_params=pltpu.CompilerParams(
            # Independent batch tiles: shard across TensorCores on v7x.
            dimension_semantics=("parallel",),
            vmem_limit_bytes=64 << 20,
        ),
    )(x_in, w1p, b1p, w2p, b2p)

    # Drop batch padding and the zero-padded latent lanes.
    return out[:B, :latent]


def init_params(key, latent_dims=16, dtype=jnp.float32):
    """Deterministic init mimicking nn.Linear's U(-1/sqrt(fan_in), +1/sqrt(fan_in))."""
    k1, k2, k3, k4 = jax.random.split(key, 4)
    bound1 = 1.0 / jnp.sqrt(float(IN_FEATURES))
    bound2 = 1.0 / jnp.sqrt(float(HIDDEN))
    # Stored as (in, out) = transpose of PyTorch's (out, in) weight.
    w1 = jax.random.uniform(k1, (IN_FEATURES, HIDDEN), dtype, -bound1, bound1)
    b1 = jax.random.uniform(k2, (HIDDEN,), dtype, -bound1, bound1)
    w2 = jax.random.uniform(k3, (HIDDEN, latent_dims), dtype, -bound2, bound2)
    b2 = jax.random.uniform(k4, (latent_dims,), dtype, -bound2, bound2)
    return w1, b1, w2, b2


def encoder_ref(x, w1, b1, w2, b2):
    """Pure f32 JAX reference (matches the PyTorch module)."""
    x2d = x.reshape(x.shape[0], -1)
    h = jnp.maximum(x2d @ w1 + b1.reshape(1, -1), 0.0)
    return h @ w2 + b2.reshape(1, -1)


def encoder_ref_matched(x, params, latent):
    """Reference mirroring the kernel's bf16-input / f32-accumulate precision."""
    w1p, b1p, w2p, b2p = params
    x2d = x.reshape(x.shape[0], -1).astype(w1p.dtype).astype(jnp.float32)
    h = jnp.maximum(x2d @ w1p.astype(jnp.float32) + b1p, 0.0)
    h = h.astype(w2p.dtype).astype(jnp.float32)
    z = h @ w2p.astype(jnp.float32) + b2p
    return z[:, :latent]


if __name__ == "__main__":
    key = jax.random.PRNGKey(0)
    kx, kp = jax.random.split(key)

    latent_dims = 16
    w1, b1, w2, b2 = init_params(kp, latent_dims=latent_dims)

    # Case 1: multi-tile batch (exercises batch pipelining), bf16 compute dtype.
    B = 24
    x = jax.random.normal(kx, (B, IN_FEATURES), dtype=jnp.float32)
    params_bf16, latent = prepare_params(w1, b1, w2, b2, use_bf16=True)
    out = jax.block_until_ready(encoder_forward(x, params_bf16, latent, tb=8))
    assert out.shape == (B, latent_dims), out.shape
    ref_m = encoder_ref_matched(x, params_bf16, latent)
    assert jnp.allclose(out, ref_m, atol=5e-3, rtol=5e-3), "bf16 kernel vs matched ref"
    ref_f32 = encoder_ref(x, w1, b1, w2, b2)
    assert jnp.allclose(out, ref_f32, atol=5e-2, rtol=5e-2), "bf16 kernel vs f32 ref"

    # Case 2: small single-tile batch, full f32 compute (tight correctness check).
    B2 = 4
    x2 = jax.random.normal(jax.random.PRNGKey(1), (B2, IN_FEATURES),
                           dtype=jnp.float32)
    params_f32, latent = prepare_params(w1, b1, w2, b2, use_bf16=False)
    out2 = jax.block_until_ready(encoder_forward(x2, params_f32, latent))
    assert out2.shape == (B2, latent_dims), out2.shape
    ref2 = encoder_ref(x2, w1, b1, w2, b2)
    assert jnp.allclose(out2, ref2, atol=1e-4, rtol=1e-4), "f32 kernel vs ref"

    print("KERNEL_OK")
</pallas_src>

<mosaic_0001>
module attributes {stable_mosaic.version = 11 : i64} {
  func.func @encoder_kernel(%arg0: i32, %arg1: memref<8x2000xbf16, #tpu.memory_space<vmem>>, %arg2: memref<2000x128xbf16, #tpu.memory_space<vmem>>, %arg3: memref<1x128xf32, #tpu.memory_space<vmem>>, %arg4: memref<128x128xbf16, #tpu.memory_space<vmem>>, %arg5: memref<1x128xf32, #tpu.memory_space<vmem>>, %arg6: memref<8x128xf32, #tpu.memory_space<vmem>>) attributes {dimension_semantics = [#tpu.dimension_semantics<parallel>], iteration_bounds = array<i64: 3>, scalar_prefetch = 0 : i64, scratch_operands = 0 : i64, tpu.core_type = #tpu.core_type<tc>, window_params = [{transform_indices = @transform_0, window_bounds = array<i64: 8, 2000>}, {pipeline_mode = #tpu.pipeline_mode<synchronous>, transform_indices = @transform_1, window_bounds = array<i64: 2000, 128>}, {pipeline_mode = #tpu.pipeline_mode<synchronous>, transform_indices = @transform_2, window_bounds = array<i64: 1, 128>}, {pipeline_mode = #tpu.pipeline_mode<synchronous>, transform_indices = @transform_3, window_bounds = array<i64: 128, 128>}, {pipeline_mode = #tpu.pipeline_mode<synchronous>, transform_indices = @transform_4, window_bounds = array<i64: 1, 128>}, {transform_indices = @transform_5, window_bounds = array<i64: 8, 128>}]} {
    %c0 = arith.constant 0 : index
    %c0_0 = arith.constant 0 : index
    %0 = vector.load %arg1[%c0, %c0_0] : memref<8x2000xbf16, #tpu.memory_space<vmem>>, vector<8x2000xbf16>
    %c0_1 = arith.constant 0 : index
    %c0_2 = arith.constant 0 : index
    %1 = vector.load %arg2[%c0_1, %c0_2] : memref<2000x128xbf16, #tpu.memory_space<vmem>>, vector<2000x128xbf16>
    %cst = arith.constant dense<0.000000e+00> : vector<8x128xf32>
    %2 = tpu.matmul %0, %1, %cst {dimension_numbers = #tpu.dot_dimension_numbers<[1], [0], [0], [1], [0, 0, 1, 1], [], []>} : vector<8x2000xbf16>, vector<2000x128xbf16>, vector<8x128xf32> -> vector<8x128xf32>
    %c0_3 = arith.constant 0 : index
    %c0_4 = arith.constant 0 : index
    %3 = vector.load %arg3[%c0_3, %c0_4] : memref<1x128xf32, #tpu.memory_space<vmem>>, vector<1x128xf32>
    %4 = vector.broadcast %3 : vector<1x128xf32> to vector<8x128xf32>
    %5 = arith.addf %2, %4 : vector<8x128xf32>
    %cst_5 = arith.constant 0.000000e+00 : f32
    %6 = vector.broadcast %cst_5 : f32 to vector<8x128xf32>
    %7 = arith.maximumf %5, %6 : vector<8x128xf32>
    %8 = arith.truncf %7 : vector<8x128xf32> to vector<8x128xbf16>
    %c0_6 = arith.constant 0 : index
    %c0_7 = arith.constant 0 : index
    %9 = vector.load %arg4[%c0_6, %c0_7] : memref<128x128xbf16, #tpu.memory_space<vmem>>, vector<128x128xbf16>
    %cst_8 = arith.constant dense<0.000000e+00> : vector<8x128xf32>
    %10 = tpu.matmul %8, %9, %cst_8 {dimension_numbers = #tpu.dot_dimension_numbers<[1], [0], [0], [1], [0, 0, 1, 1], [], []>} : vector<8x128xbf16>, vector<128x128xbf16>, vector<8x128xf32> -> vector<8x128xf32>
    %c0_9 = arith.constant 0 : index
    %c0_10 = arith.constant 0 : index
    %11 = vector.load %arg5[%c0_9, %c0_10] : memref<1x128xf32, #tpu.memory_space<vmem>>, vector<1x128xf32>
    %12 = vector.broadcast %11 : vector<1x128xf32> to vector<8x128xf32>
    %13 = arith.addf %10, %12 : vector<8x128xf32>
    %c0_11 = arith.constant 0 : index
    %c0_12 = arith.constant 0 : index
    %14 = vector.load %arg6[%c0_11, %c0_12] : memref<8x128xf32, #tpu.memory_space<vmem>>, vector<8x128xf32>
    tpu.vector_store %arg6[%c0_11, %c0_12], %13 {strides = array<i32>} : memref<8x128xf32, #tpu.memory_space<vmem>>, vector<8x128xf32>,
    return
  }
  func.func @transform_0(%arg0: i32) -> (i32, i32) {
    %c0_i32 = arith.constant 0 : i32
    %c0_i32_0 = arith.constant 0 : i32
    return %arg0, %c0_i32 : i32, i32
  }
  func.func @transform_1(%arg0: i32) -> (i32, i32) {
    %c0_i32 = arith.constant 0 : i32
    %c0_i32_0 = arith.constant 0 : i32
    %c0_i32_1 = arith.constant 0 : i32
    return %c0_i32, %c0_i32_0 : i32, i32
  }
  func.func @transform_2(%arg0: i32) -> (i32, i32) {
    %c0_i32 = arith.constant 0 : i32
    %c0_i32_0 = arith.constant 0 : i32
    %c0_i32_1 = arith.constant 0 : i32
    return %c0_i32, %c0_i32_0 : i32, i32
  }
  func.func @transform_3(%arg0: i32) -> (i32, i32) {
    %c0_i32 = arith.constant 0 : i32
    %c0_i32_0 = arith.constant 0 : i32
    %c0_i32_1 = arith.constant 0 : i32
    return %c0_i32, %c0_i32_0 : i32, i32
  }
  func.func @transform_4(%arg0: i32) -> (i32, i32) {
    %c0_i32 = arith.constant 0 : i32
    %c0_i32_0 = arith.constant 0 : i32
    %c0_i32_1 = arith.constant 0 : i32
    return %c0_i32, %c0_i32_0 : i32, i32
  }
  func.func @transform_5(%arg0: i32) -> (i32, i32) {
    %c0_i32 = arith.constant 0 : i32
    %c0_i32_0 = arith.constant 0 : i32
    return %arg0, %c0_i32 : i32, i32
  }
}

</mosaic_0001>

<bundles_post_ra>
// kernel: tpu_custom_call.1
= control target key start
LH: loop header
LB: loop body
LE: loop exit
PB: predicated region body
PF: predicated region fallthrough
CT: control target
= control target key end

     0   :  { %10 = vsyncpa [#allocation3], 0  ;;  %s3086_s0 = inlined_call_operand.hbm [shape: bf16[24,2000], index: 0, kind: input, shape index: {}]   ;;  %s3087_s1 = inlined_call_operand.hbm [shape: bf16[2000,128], index: 1, kind: input, shape index: {}]   ;;  %s3088_s2 = inlined_call_operand.hbm [shape: f32[1,128], index: 2, kind: input, shape index: {}]   ;;  %s3089_s3 = inlined_call_operand.hbm [shape: bf16[128,128], index: 3, kind: input, shape index: {}]   ;;  %s3090_s4 = inlined_call_operand.hbm [shape: f32[1,128], index: 4, kind: input, shape index: {}]   ;;  %s3091_s5 = inlined_call_operand.hbm [shape: f32[24,128], index: 5, kind: output, shape index: {}]  }
   0x1   :  { %12 = vsyncpa [#allocation3 + $0x1], 0 }
   0x2   :  { %13 = vsyncpa [#allocation6], 0 }
   0x3   :  { %14 = vsyncpa [#allocation9], 0 }
   0x4   :  { %15 = vsyncpa [#allocation4], 0 }
   0x5   :  { %17 = vsyncpa [#allocation4 + $0x1], 0  ;;  %s2783_s18 = smov 0   ;;  %s2785_s19 = smov 0  }
   0x6   :  { %s2787_s20 = smov 0   ;;  %s2789_s21 = smov 0  }
   0x7 LB: > { %s2742_s22 = smov [#allocation5]   ;;  %s2804_s24 = sadd.s32 4294967295, %s2740_s21   ;;  %s2740_s21 = sphi %s2789_s21, %s3114_s21   ;;  %s2736_s20 = sphi %s2787_s20, %s3113_s20   ;;  %s2732_s19 = sphi %s2785_s19, %s3112_s19   ;;  %s2728_s18 = sphi %s2783_s18, %s3111_s18  }
   0x8   : > { %s176_s23 = sshll.u32 %s2742_s22, 4  ;;  %p1927_p0 = scmp.ge.s32.totalorder %s2740_s21, 1  ;;  %s2809_s23 = int_to_ptr.vmem [resolvable:$true] %s176_s23 }
   0x9   : > { %p3092_p1 = scmp.eq.s32.totalorder %s2804_s24, 0  ;;  %p164_p2 = scmp.lt.s32.totalorder %s2740_s21, 4 }
   0xa   : > { %s2743_s26 = smov [#allocation8]   ;;  %s2744_s29 = smov [#allocation7]  }
   0xb   : > { %p2811_p3 = pnand %p1927_p0, %p164_p2  ;;  %s200_s27 = sshll.u32 %s2743_s26, 4  ;;  %s2823_s27 = int_to_ptr.vmem [resolvable:$true] %s200_s27 }
   0xc   : > { %s190_s30 = sshll.u32 %s2744_s29, 4  ;;  %s2524_s8 = scalar_lea.hbm %s3087_s1, 16000  ;;  %s2825_s30 = int_to_ptr.vmem [resolvable:$true] %s190_s30 }
   0xd   : > { %s3095_s25 = scalar_select %p2811_p3, 1, 0 }
   0xe   : > { %p2303_p4 = pneg %p2811_p3  ;;  %p2525_p6 = scmp.ne.s32.totalorder %s3087_s1, %s2524_s8 }
   0xf   : > { %p2531_p10 = scmp.lt.u32.totalorder %s2524_s8, %s3087_s1 }
  0x10   : > { %p2819_p5 = pnand %p2303_p4, %p3092_p1 }
  0x12   : > { %p2835_p7 = pneg %p2819_p5 }
  0x14   : > { %p2527_p8 = pnand %p2835_p7, %p2525_p6 }
  0x16   : > { %p2528_p9 = pneg %p2527_p8 }
  0x18   : > { %p2533_p11 = pnand %p2531_p10, %p2528_p9 }
  0x1a   : > { %2536 = shalt.err (!%p2533_p11)
}
  0x1b   : > { %s2537_s14 = scalar_lea.vmem %s2809_s23, 16000  ;;  %p2545_p2 = scmp.lt.s32.totalorder %s2809_s23, %s2809_s23 }
  0x1c   : > { %p2538_p12 = scmp.ne.s32.totalorder %s2809_s23, %s2537_s14  ;;  %p2546_p4 = scmp.lt.s32.totalorder %s2537_s14, %s2537_s14 }
  0x1e   : > { %p2540_p13 = pnand %p2538_p12, %p2835_p7  ;;  %p2547_p6 = por %p2546_p4, %p2545_p2 }
  0x20   : > { %p2541_p0 = pneg %p2540_p13 }
  0x22   : > { %p2548_p8 = pnand %p2547_p6, %p2541_p0 }
  0x24   : > { %2551 = shalt.err (!%p2548_p8)
}
  0x25   : > { %s2745_s15 = smov 64   ;;  %s2746_s16 = smov 4  }
  0x26   : > { %2306 = dma.hbm_to_vmem [thread:$0]  (!%p2819_p5), %s3087_s1, 16000, %s2809_s23, [#allocation6], %s2745_s15, %s2745_s15, %s2746_s16  }
  0x27   : > { %s2552_s6 = scalar_lea.hbm %s3089_s3, 1024 }
  0x28   : > { %p2553_p9 = scmp.ne.s32.totalorder %s3089_s3, %s2552_s6  ;;  %p2559_p12 = scmp.lt.u32.totalorder %s2552_s6, %s3089_s3 }
  0x2a   : > { %p2555_p10 = pnand %p2553_p9, %p2835_p7 }
  0x2c   : > { %p2556_p11 = pneg %p2555_p10 }
  0x2e   : > { %p2561_p13 = pnand %p2559_p12, %p2556_p11 }
  0x30   : > { %2564 = shalt.err (!%p2561_p13)
}
  0x31   : > { %s2565_s23 = scalar_lea.vmem %s2823_s27, 1024  ;;  %p2573_p6 = scmp.lt.s32.totalorder %s2823_s27, %s2823_s27 }
  0x32   : > { %p2566_p0 = scmp.ne.s32.totalorder %s2823_s27, %s2565_s23  ;;  %p2574_p8 = scmp.lt.s32.totalorder %s2565_s23, %s2565_s23 }
  0x34   : > { %p2568_p2 = pnand %p2566_p0, %p2835_p7  ;;  %p2575_p9 = por %p2574_p8, %p2573_p6 }
  0x36   : > { %p2569_p4 = pneg %p2568_p2 }
  0x38   : > { %p2576_p10 = pnand %p2575_p9, %p2569_p4 }
  0x3a   : > { %2579 = shalt.err (!%p2576_p10)
}
  0x3b   : > { %2312 = dma.hbm_to_vmem [thread:$0]  (!%p2819_p5), %s3089_s3, 1024, %s2823_s27, [#allocation9], %s2745_s15, %s2745_s15, %s2746_s16  }
  0x3c   : > { %s2580_s22 = scalar_lea.hbm %s3088_s2, 16 }
  0x3d   : > { %p2581_p11 = scmp.ne.s32.totalorder %s3088_s2, %s2580_s22  ;;  %p2587_p0 = scmp.lt.u32.totalorder %s2580_s22, %s3088_s2 }
  0x3f   : > { %p2583_p12 = pnand %p2581_p11, %p2835_p7 }
  0x41   : > { %p2584_p13 = pneg %p2583_p12 }
  0x43   : > { %p2589_p2 = pnand %p2587_p0, %p2584_p13 }
  0x45   : > { %2592 = shalt.err (!%p2589_p2)
}
  0x46   : > { %s2593_s27 = scalar_lea.vmem %s2825_s30, 16  ;;  %s2600_s15 = scalar_lea.vmem %s2825_s30, 32 }
  0x47   : > { %p2594_p4 = scmp.ne.s32.totalorder %s2825_s30, %s2593_s27  ;;  %p2601_p9 = scmp.lt.s32.totalorder %s2825_s30, %s2825_s30 }
  0x48   : > { %p2602_p10 = scmp.lt.s32.totalorder %s2600_s15, %s2593_s27 }
  0x49   : > { %p2596_p6 = pnand %p2594_p4, %p2835_p7 }
  0x4a   : > { %p2603_p11 = por %p2602_p10, %p2601_p9 }
  0x4b   : > { %p2597_p8 = pneg %p2596_p6 }
  0x4d   : > { %p2604_p12 = pnand %p2603_p11, %p2597_p8 }
  0x4f   : > { %2607 = shalt.err (!%p2604_p12)
}
  0x50   : > { %2309 = dma.hbm_to_vmem [thread:$0]  (!%p2819_p5), %s3088_s2, 16, %s2825_s30, [#allocation6]  }
  0x51   : > { %s2747_s9 = smov [#allocation10]   ;;  %s2608_s13 = scalar_lea.hbm %s3090_s4, 16 }
  0x52   : > { %s214_s10 = sshll.u32 %s2747_s9, 4  ;;  %p2609_p13 = scmp.ne.s32.totalorder %s3090_s4, %s2608_s13  ;;  %s215_s10 = int_to_ptr.vmem [resolvable:$true] %s214_s10 }
  0x53   : > { %p2615_p4 = scmp.lt.u32.totalorder %s2608_s13, %s3090_s4 }
  0x54   : > { %p2611_p0 = pnand %p2609_p13, %p2835_p7 }
  0x56   : > { %p2612_p2 = pneg %p2611_p0 }
  0x58   : > { %p2617_p6 = pnand %p2615_p4, %p2612_p2 }
  0x5a   : > { %2620 = shalt.err (!%p2617_p6)
}
  0x5b   : > { %s2621_s30 = scalar_lea.vmem %s215_s10, 16  ;;  %s2628_s29 = scalar_lea.vmem %s215_s10, 32 }
  0x5c   : > { %p2622_p8 = scmp.ne.s32.totalorder %s215_s10, %s2621_s30  ;;  %p2629_p11 = scmp.lt.s32.totalorder %s215_s10, %s215_s10 }
  0x5d   : > { %p2630_p12 = scmp.lt.s32.totalorder %s2628_s29, %s2621_s30 }
  0x5e   : > { %p2624_p9 = pnand %p2622_p8, %p2835_p7 }
  0x5f   : > { %p2631_p1 = por %p2630_p12, %p2629_p11 }
  0x60   : > { %p2625_p10 = pneg %p2624_p9 }
  0x62   : > { %p2632_p3 = pnand %p2631_p1, %p2625_p10 }
  0x64   : > { %2635 = shalt.err (!%p2632_p3)
}
  0x65   : > { %2315 = dma.hbm_to_vmem [thread:$0]  (!%p2819_p5), %s3090_s4, 16, %s215_s10, [#allocation9]  }
  0x66   : > { %s1926_s11 = sadd.s32 4294967294, %s2740_s21   ;;  %s2923_s28 = sadd.s32 1, %s2740_s21  }
  0x67   : > { %s27_s27 = ssub.s32 %s2740_s21, %s2923_s28  ;;  %s30_s15 = sadd.s32 1, %s2736_s20 }
  0x68   : > { %p28_p1 = scmp.eq.s32.totalorder %s27_s27, 0  ;;  %p37_p3 = scmp.ne.s32.totalorder %s2736_s20, %s2732_s19 }
  0x69   : > { %p38_p7 = scmp.eq.s32.totalorder %s2740_s21, 0  ;;  %p43_p13 = scmp.ne.s32.totalorder %s2732_s19, %s2728_s18 }
  0x6a   : > { %s2934_s16 = scalar_select %p28_p1, %s2736_s20, %s30_s15  }
  0x6b   : > { %p2936_p0 = por %p38_p7, %p37_p3  ;;  %p3099_p2 = scmp.eq.s32.totalorder %s2804_s24, 0 }
  0x6c   : > { %p151_p4 = scmp.eq.s32.totalorder %s2804_s24, 2  ;;  %p157_p6 = scmp.eq.s32.totalorder %s1926_s11, 2 }
  0x6d   : > { %p2942_p5 = por %p3099_p2, %p43_p13  ;;  %p2328_p8 = scmp.lt.s32.totalorder %s2740_s21, 3 }
  0x6e   : > { %s225_s10 = sand.u32 1, %s2736_s20   ;;  %p2949_p9 = por %p151_p4, %p37_p3 }
  0x6f   : > { %p2953_p10 = por %p157_p6, %p43_p13  ;;  %s1933_s13 = sshll.u32 %s225_s10, 6 }
  0x70   : > { %s3101_s23 = scalar_select %p2949_p9, 1, 0 }
  0x71   : > { %s3102_s12 = scalar_select %p2953_p10, 1, 0 }
  0x72   : > { %s2099_s14 = sshll.u32 %s2740_s21, 10  ;;  %s229_s30 = scalar_lea.vmem [#allocation2], %s1933_s13 }
  0x73   : > { %s2961_s26 = scalar_lea.hbm %s3086_s0, %s2099_s14  ;;  %s237_s29 = sshll.u32 %s229_s30, 4  ;;  %s2963_s29 = int_to_ptr.vmem [resolvable:$true] %s237_s29 }
  0x74   : > { %p2967_p11 = pnand %p2328_p8, %p2936_p0  ;;  %s226_s7 = scalar_lea.sflag [#allocation3], %s225_s10 }
  0x75   : > { %s2636_s11 = scalar_lea.hbm %s2961_s26, 1024  ;;  %s2641_s13 = scalar_lea.hbm %s3086_s0, 3072 }
  0x76   : > { %p2637_p12 = scmp.ne.s32.totalorder %s2961_s26, %s2636_s11  ;;  %p2638_p1 = pneg %p2967_p11 }
  0x77   : > { %p2642_p13 = scmp.lt.u32.totalorder %s2961_s26, %s3086_s0  ;;  %p2643_p0 = scmp.lt.u32.totalorder %s2641_s13, %s2636_s11 }
  0x78   : > { %p2639_p3 = pnand %p2638_p1, %p2637_p12  ;;  %p2645_p4 = scmp.lt.u32.totalorder %s2636_s11, %s2961_s26 }
  0x79   : > { %p2644_p2 = por %p2643_p0, %p2642_p13 }
  0x7a   : > { %p2640_p7 = pneg %p2639_p3 }
  0x7b   : > { %p2646_p6 = por %p2645_p4, %p2644_p2 }
  0x7d   : > { %p2647_p8 = pnand %p2646_p6, %p2640_p7 }
  0x7f   : > { %2650 = shalt.err (!%p2647_p8)
}
  0x80   : > { %s2651_s10 = scalar_lea.vmem %s2963_s29, 1024  ;;  %s2748_s17 = smov [#allocation2]  }
  0x81   : > { %p2652_p12 = scmp.ne.s32.totalorder %s2963_s29, %s2651_s10  ;;  %s2656_s22 = sshll.u32 %s2748_s17, 4  ;;  %s2657_s22 = int_to_ptr.vmem [resolvable:$false] %s2656_s22 }
  0x82   : > { %s2658_s30 = scalar_lea.vmem %s2657_s22, 2048  ;;  %p2659_p9 = scmp.lt.s32.totalorder %s2963_s29, %s2657_s22 }
  0x83   : > { %p2654_p3 = pnand %p2652_p12, %p2638_p1  ;;  %p2660_p13 = scmp.lt.s32.totalorder %s2658_s30, %s2651_s10 }
  0x85   : > { %p2655_p10 = pneg %p2654_p3  ;;  %p2661_p0 = por %p2660_p13, %p2659_p9 }
  0x87   : > { %p2662_p2 = pnand %p2661_p0, %p2655_p10 }
  0x89   : > { %2665 = shalt.err (!%p2662_p2)
}
  0x8a   : > { %2319 = dma.hbm_to_vmem [thread:$0]  (!%p2967_p11), %s2961_s26, 1024, %s2963_s29, %s226_s7  }
  0x8b   : > { %p3104_p7 = scmp.ne.s32.totalorder %s3095_s25, 0 }
  0x8c   : > { %s2999_s11 = sand.u32 (!%p3104_p7), 1, %s2732_s19  }
  0x8d   : > { %246 = sbr.rel (%p3104_p7) target bundleno = 752 (0x2f0), region = 40  ;;  %s1937_s27 = sshll.u32 (!%p3104_p7), %s2999_s11, 6 }
  0x8e   : > { %s249_s15 = scalar_lea.sflag (!%p3104_p7), [#allocation3], %s2999_s11  ;;  %s3003_s13 = scalar_lea.vmem (!%p3104_p7), [#allocation2], %s1937_s27 }
  0x94   : > { %2711 = dma.done.wait (%p2942_p5), %s249_s15, 1024  }
  0x95   : > { %2713 = vsyncadd (%p2942_p5), %s249_s15, 4294966272  ;;  %p3105_p9 = scmp.eq.s32.totalorder %s2804_s24, 0 }
  0x97   : > { %2715 = dma.done.wait (%p3105_p9), [#allocation6], 16016   ;;  %p3106_p10 = pmov %p3105_p9 }
  0x98   : > { %p3107_p11 = pmov %p3105_p9 }
  0x99   : > { %2717 = vsyncadd (%p3106_p10), [#allocation6], 4294951280 }
  0x9a   : > { %2719 = dma.done.wait (%p3107_p11), [#allocation9], 1040   ;;  %p3108_p1 = pmov %p3105_p9 }
  0x9b   : > { %v2375_v0 = vld [vmem:[#allocation5 + $0x40] sm:$0xff]   ;;  %v2379_v4 = vld [vmem:[#allocation5 + $0x48] sm:$0xff]   ;;  %v2383_v8 = vld [vmem:[#allocation5 + $0x50] sm:$0xff]   ;;  %vm1366_vm0 = vcmask 654336   ;;  %vm2751_vm1 = vmmov 0   ;;  %s1942_s25 = sshll.u32 %s2999_s11, 3 }
  0x9c   : > { %2721 = vsyncadd (%p3108_p1), [#allocation9], 4294966256  ;;  %v2376_v1 = vld [vmem:[#allocation5 + $0xc0] sm:$0xff]   ;;  %2100 = vmatprep.subr.bf16.mxu0 %v2375_v0  ;;  %v2380_v5 = vld [vmem:[#allocation5 + $0xc8] sm:$0xff]   ;;  %s2096_s9 = sshll.u32 %s2804_s24, 7  ;;  %s294_s26 = scalar_lea.vmem [#allocation11], %s1942_s25 }
  0x9d   : > { %v2377_v2 = vld [vmem:[#allocation5] sm:$0xff]   ;;  %2122 = vmatprep.subr.bf16.mxu1 %v2376_v1  ;;  %v2381_v6 = vld [vmem:[#allocation5 + $0x8] sm:$0xff]   ;;  %v2384_v9 = vld [vmem:[#allocation5 + $0xd0] sm:$0xff]   ;;  %s1818_s29 = sshll.u32 %s294_s26, 4  ;;  %s3043_s8 = scalar_lea.hbm %s3091_s5, %s2096_s9  ;;  %s3045_s29 = int_to_ptr.vmem [resolvable:$true] %s1818_s29 }
  0x9e   : > { %v2378_v3 = vld [vmem:[#allocation5 + $0x80] sm:$0xff]   ;;  %2101 = vmatpush3.bf16.msra.mxu0 %v2377_v2  ;;  %v2382_v7 = vld [vmem:[#allocation5 + $0x88] sm:$0xff]   ;;  %v2385_v10 = vld [vmem:[#allocation5 + $0x10] sm:$0xff]   ;;  %s1805_s14 = scalar_lea.sflag [#allocation4], %s2999_s11  ;;  %s2666_s24 = scalar_lea.vmem %s3045_s29, 128 }
  0x9f   : > { %2123 = vmatpush3.bf16.msra.mxu1 %v2378_v3  ;;  %2102 = vmatprep.subr.bf16.mxu0 %v2379_v4  ;;  %v2386_v11 = vld [vmem:[#allocation5 + $0x90] sm:$0xff]   ;;  %v2387_v12 = vld [vmem:[#allocation5 + $0x58] sm:$0xff]   ;;  %v2391_v16 = vld [vmem:[#allocation5 + $0x60] sm:$0xff]   ;;  %p2667_p5 = scmp.ne.s32.totalorder %s3045_s29, %s2666_s24  ;;  %p3109_p4 = scmp.ne.s32.totalorder %s3101_s23, 0 }
  0xa0   : > { %2124 = vmatprep.subr.bf16.mxu1 %v2380_v5  ;;  %v2388_v13 = vld [vmem:[#allocation5 + $0xd8] sm:$0xff]   ;;  %v2392_v17 = vld [vmem:[#allocation5 + $0xe0] sm:$0xff]   ;;  %v2395_v20 = vld [vmem:[#allocation5 + $0x68] sm:$0xff]   ;;  %s2752_s10 = smov [#allocation11]  }
  0xa1   : > { %v2389_v14 = vld [vmem:[#allocation5 + $0x18] sm:$0xff]   ;;  %v2393_v18 = vld [vmem:[#allocation5 + $0x20] sm:$0xff]   ;;  %v2396_v21 = vld [vmem:[#allocation5 + $0xe8] sm:$0xff]   ;;  %p2668_p6 = pnand %p2667_p5, %p3109_p4  ;;  %s2670_s17 = sshll.u32 %s2752_s10, 4  ;;  %s2671_s17 = int_to_ptr.vmem [resolvable:$false] %s2670_s17 }
  0xa2   : > { %2103 = vmatpush3.bf16.msra.mxu0 %v2381_v6  ;;  %v2390_v15 = vld [vmem:[#allocation5 + $0x98] sm:$0xff]   ;;  %v2394_v19 = vld [vmem:[#allocation5 + $0xa0] sm:$0xff]   ;;  %v2397_v22 = vld [vmem:[#allocation5 + $0x28] sm:$0xff]   ;;  %s2672_s22 = scalar_lea.vmem %s2671_s17, 256  ;;  %p2673_p12 = scmp.lt.s32.totalorder %s3045_s29, %s2671_s17 }
  0xa3   : > { %2125 = vmatpush3.bf16.msra.mxu1 %v2382_v7  ;;  %2104 = vmatprep.subr.bf16.mxu0 %v2383_v8  ;;  %v2398_v23 = vld [vmem:[#allocation5 + $0xa8] sm:$0xff]   ;;  %v2399_v24 = vld [vmem:[#allocation5 + $0x70] sm:$0xff]   ;;  %v2403_v28 = vld [vmem:[#allocation5 + $0x78] sm:$0xff]   ;;  %p2669_p8 = pneg %p2668_p6  ;;  %p2674_p3 = scmp.lt.s32.totalorder %s2672_s22, %s2666_s24 }
  0xa4   : > { %2126 = vmatprep.subr.bf16.mxu1 %v2384_v9  ;;  %v2400_v25 = vld [vmem:[#allocation5 + $0xf0] sm:$0xff]   ;;  %v2404_v29 = vld [vmem:[#allocation5 + $0xf8] sm:$0xff]   ;;  %v296_v32 = vld [vmem:[%s3003_s13] sm:$0xff] }
  0xa5   : > { %v2401_v26 = vld [vmem:[#allocation5 + $0x30] sm:$0xff]   ;;  %v2405_v30 = vld [vmem:[#allocation5 + $0x38] sm:$0xff]   ;;  %v297_v33 = vld [vmem:[%s3003_s13 + $0x8] sm:$0xff]  ;;  %v1944_v34 = vcombine.low %v296_v32, %v296_v32  ;;  %v1945_v35 = vcombine.high %v296_v32, %v296_v32  ;;  %p2675_p13 = por %p2674_p3, %p2673_p12 }
  0xa6   : > { %2105 = vmatpush3.bf16.msra.mxu0 %v2385_v10  ;;  %v2402_v27 = vld [vmem:[#allocation5 + $0xb0] sm:$0xff]   ;;  %v2406_v31 = vld [vmem:[#allocation5 + $0xb8] sm:$0xff]   ;;  %v1946_v36 = vcombine.low %v297_v33, %v297_v33  ;;  %v1947_v37 = vcombine.high %v297_v33, %v297_v33  ;;  %v2411_v38 = vld [vmem:[#allocation5 + $0x140] sm:$0xff]  }
  0xa7   : > { %2127 = vmatpush3.bf16.msra.mxu1 %v2386_v11  ;;  %2106 = vmatprep.subr.bf16.mxu0 %v2387_v12  ;;  %v2412_v39 = vld [vmem:[#allocation5 + $0x1c0] sm:$0xff]   ;;  %v2415_v42 = vld [vmem:[#allocation5 + $0x148] sm:$0xff]   ;;  %v2419_v46 = vld [vmem:[#allocation5 + $0x150] sm:$0xff]   ;;  %p2676_p0 = pnand %p2675_p13, %p2669_p8 }
  0xa8   : > { %2128 = vmatprep.subr.bf16.mxu1 %v2388_v13  ;;  %1402 = vmatprep.mubr.bf16.mxu0 %v1945_v35  ;;  %v2413_v40 = vld [vmem:[#allocation5 + $0x100] sm:$0xff]   ;;  %v2416_v43 = vld [vmem:[#allocation5 + $0x1c8] sm:$0xff]   ;;  %v2420_v47 = vld [vmem:[#allocation5 + $0x1d0] sm:$0xff]  }
  0xa9   : > { %1442 = vmatprep.mubr.bf16.mxu1 %v1947_v37  ;;  %v2414_v41 = vld [vmem:[#allocation5 + $0x180] sm:$0xff]   ;;  %v2417_v44 = vld [vmem:[#allocation5 + $0x108] sm:$0xff]   ;;  %v2421_v48 = vld [vmem:[#allocation5 + $0x110] sm:$0xff]  }
  0xaa   : > { %2107 = vmatpush3.bf16.msra.mxu0 %v2389_v14  ;;  %v2418_v45 = vld [vmem:[#allocation5 + $0x188] sm:$0xff]   ;;  %v2422_v49 = vld [vmem:[#allocation5 + $0x190] sm:$0xff]   ;;  %v2423_v50 = vld [vmem:[#allocation5 + $0x158] sm:$0xff]  }
  0xab   : > { %2129 = vmatpush3.bf16.msra.mxu1 %v2390_v15  ;;  %2108 = vmatprep.subr.bf16.mxu0 %v2391_v16  ;;  %v2424_v51 = vld [vmem:[#allocation5 + $0x1d8] sm:$0xff]   ;;  %v2427_v54 = vld [vmem:[#allocation5 + $0x160] sm:$0xff]   ;;  %v2431_v58 = vld [vmem:[#allocation5 + $0x168] sm:$0xff]  }
  0xac   : > { %2130 = vmatprep.subr.bf16.mxu1 %v2392_v17  ;;  %v2425_v52 = vld [vmem:[#allocation5 + $0x118] sm:$0xff]   ;;  %v2428_v55 = vld [vmem:[#allocation5 + $0x1e0] sm:$0xff]   ;;  %v2432_v59 = vld [vmem:[#allocation5 + $0x1e8] sm:$0xff]  }
  0xad   : > { %v2426_v53 = vld [vmem:[#allocation5 + $0x198] sm:$0xff]   ;;  %v2429_v56 = vld [vmem:[#allocation5 + $0x120] sm:$0xff]   ;;  %v2433_v60 = vld [vmem:[#allocation5 + $0x128] sm:$0xff]  }
  0xae   : > { %2109 = vmatpush3.bf16.msra.mxu0 %v2393_v18  ;;  %v2430_v57 = vld [vmem:[#allocation5 + $0x1a0] sm:$0xff]   ;;  %v2434_v61 = vld [vmem:[#allocation5 + $0x1a8] sm:$0xff]   ;;  %v2435_v62 = vld [vmem:[#allocation5 + $0x170] sm:$0xff]  }
  0xaf   : > { %2131 = vmatpush3.bf16.msra.mxu1 %v2394_v19  ;;  %2110 = vmatprep.subr.bf16.mxu0 %v2395_v20  ;;  %v2436_v63 = vld [vmem:[#allocation5 + $0x1f0] sm:$0xff]   ;;  %v2439_v2 = vld [vmem:[#allocation5 + $0x178] sm:$0xff]   ;;  %v2447_v12 = vld [vmem:[#allocation5 + $0x240] sm:$0xff]  }
  0xb0   : > { %2132 = vmatprep.subr.bf16.mxu1 %v2396_v21  ;;  %v2437_v0 = vld [vmem:[#allocation5 + $0x130] sm:$0xff]   ;;  %v2440_v3 = vld [vmem:[#allocation5 + $0x1f8] sm:$0xff]   ;;  %v2448_v13 = vld [vmem:[#allocation5 + $0x2c0] sm:$0xff]  }
  0xb1   : > { %v2438_v1 = vld [vmem:[#allocation5 + $0x1b0] sm:$0xff]   ;;  %v2441_v4 = vld [vmem:[#allocation5 + $0x138] sm:$0xff]   ;;  %v2449_v14 = vld [vmem:[#allocation5 + $0x200] sm:$0xff]  }
  0xb2   : > { %2111 = vmatpush3.bf16.msra.mxu0 %v2397_v22  ;;  %v2442_v5 = vld [vmem:[#allocation5 + $0x1b8] sm:$0xff]   ;;  %v298_v6 = vld [vmem:[%s3003_s13 + $0x10] sm:$0xff]  ;;  %v2450_v15 = vld [vmem:[#allocation5 + $0x280] sm:$0xff]  }
  0xb3   : > { %2133 = vmatpush3.bf16.msra.mxu1 %v2398_v23  ;;  %2112 = vmatprep.subr.bf16.mxu0 %v2399_v24  ;;  %v1948_v7 = vcombine.low %v298_v6, %v298_v6  ;;  %v1949_v8 = vcombine.high %v298_v6, %v298_v6  ;;  %v299_v9 = vld [vmem:[%s3003_s13 + $0x18] sm:$0xff]  ;;  %v2451_v16 = vld [vmem:[#allocation5 + $0x248] sm:$0xff]   ;;  %v2455_v20 = vld [vmem:[#allocation5 + $0x250] sm:$0xff]  }
  0xb4   : > { %2134 = vmatprep.subr.bf16.mxu1 %v2400_v25  ;;  %v1950_v10 = vcombine.low %v299_v9, %v299_v9  ;;  %v1951_v11 = vcombine.high %v299_v9, %v299_v9  ;;  %v2452_v17 = vld [vmem:[#allocation5 + $0x2c8] sm:$0xff]   ;;  %v2456_v21 = vld [vmem:[#allocation5 + $0x2d0] sm:$0xff]   ;;  %v2459_v24 = vld [vmem:[#allocation5 + $0x258] sm:$0xff]  }
  0xb5   : > { %v2453_v18 = vld [vmem:[#allocation5 + $0x208] sm:$0xff]   ;;  %v2457_v22 = vld [vmem:[#allocation5 + $0x210] sm:$0xff]   ;;  %v2460_v25 = vld [vmem:[#allocation5 + $0x2d8] sm:$0xff]  }
  0xb6   : > { %2113 = vmatpush3.bf16.msra.mxu0 %v2401_v26  ;;  %v2454_v19 = vld [vmem:[#allocation5 + $0x288] sm:$0xff]   ;;  %v2458_v23 = vld [vmem:[#allocation5 + $0x290] sm:$0xff]   ;;  %v2461_v26 = vld [vmem:[#allocation5 + $0x218] sm:$0xff]  }
  0xb7   : > { %2135 = vmatpush3.bf16.msra.mxu1 %v2402_v27  ;;  %2114 = vmatprep.subr.bf16.mxu0 %v2403_v28  ;;  %v2462_v27 = vld [vmem:[#allocation5 + $0x298] sm:$0xff]   ;;  %v2463_v28 = vld [vmem:[#allocation5 + $0x260] sm:$0xff]   ;;  %v2467_v32 = vld [vmem:[#allocation5 + $0x268] sm:$0xff]  }
  0xb8   : > { %2136 = vmatprep.subr.bf16.mxu1 %v2404_v29  ;;  %v2464_v29 = vld [vmem:[#allocation5 + $0x2e0] sm:$0xff]   ;;  %v2468_v33 = vld [vmem:[#allocation5 + $0x2e8] sm:$0xff]   ;;  %v2472_v37 = vld [vmem:[#allocation5 + $0x2f0] sm:$0xff]  }
  0xb9   : > { %v2470_v35 = vld [vmem:[#allocation5 + $0x2a8] sm:$0xff]   ;;  %v2502_v6 = vld [vmem:[#allocation5 + $0x330] sm:$0xff]  }
  0xba   : > { %2115 = vmatpush3.bf16.msra.mxu0 %v2405_v30  ;;  %v2465_v30 = vld [vmem:[#allocation5 + $0x220] sm:$0xff]  }
  0xbb   : > { %2137 = vmatpush3.bf16.msra.mxu1 %v2406_v31  ;;  %2144 = vmatprep.subr.bf16.mxu0 %v2411_v38  ;;  %v2466_v31 = vld [vmem:[#allocation5 + $0x2a0] sm:$0xff]   ;;  %v2473_v38 = vld [vmem:[#allocation5 + $0x230] sm:$0xff]  }
  0xbc   : > { %2166 = vmatprep.subr.bf16.mxu1 %v2412_v39  ;;  %v2474_v39 = vld [vmem:[#allocation5 + $0x2b0] sm:$0xff]  }
  0xbd   : > { %1403 = vmatmul.mubr.bf16.vlgmr.msra.gmra.mrb[0].mxu0 %v1944_v34  ;;  %v2469_v34 = vld [vmem:[#allocation5 + $0x228] sm:$0xff]  }
  0xbe   : > { %1443 = vmatmul.mubr.bf16.vlgmr.msra.gmra.mrb[0].mxu1 %v1946_v36  ;;  %2145 = vmatpush3.bf16.msra.mxu0 %v2413_v40  ;;  %v2471_v36 = vld [vmem:[#allocation5 + $0x270] sm:$0xff]   ;;  %v2475_v40 = vld [vmem:[#allocation5 + $0x278] sm:$0xff]  }
  0xbf   : > { %2167 = vmatpush3.bf16.msra.mxu1 %v2414_v41  ;;  %2146 = vmatprep.subr.bf16.mxu0 %v2415_v42  ;;  %v2476_v41 = vld [vmem:[#allocation5 + $0x2f8] sm:$0xff]  }
  0xc0   : > { %2168 = vmatprep.subr.bf16.mxu1 %v2416_v43  ;;  %1482 = vmatprep.mubr.bf16.mxu0 %v1949_v8  ;;  %v2477_v42 = vld [vmem:[#allocation5 + $0x238] sm:$0xff]   ;;  %v2503_v8 = vld [vmem:[#allocation5 + $0x3b0] sm:$0xff]  }
  0xc1   : > { %1522 = vmatprep.mubr.bf16.mxu1 %v1951_v11  ;;  %v2478_v43 = vld [vmem:[#allocation5 + $0x2b8] sm:$0xff]  }
  0xc2   : > { %2147 = vmatpush3.bf16.msra.mxu0 %v2417_v44  ;;  %v300_v44 = vld [vmem:[%s3003_s13 + $0x20] sm:$0xff]  ;;  %v2505_v11 = vld [vmem:[#allocation5 + $0x338] sm:$0xff]  }
  0xc3   : > { %2169 = vmatpush3.bf16.msra.mxu1 %v2418_v45  ;;  %2148 = vmatprep.subr.bf16.mxu0 %v2419_v46  ;;  %v301_v45 = vld [vmem:[%s3003_s13 + $0x28] sm:$0xff]  ;;  %v1952_v46 = vcombine.low %v300_v44, %v300_v44 }
  0xc4   : > { %2170 = vmatprep.subr.bf16.mxu1 %v2420_v47  ;;  %v1953_v47 = vcombine.high %v300_v44, %v300_v44 }
  0xc6   : > { %2149 = vmatpush3.bf16.msra.mxu0 %v2421_v48  ;;  %v1954_v48 = vcombine.low %v301_v45, %v301_v45 }
  0xc7   : > { %2171 = vmatpush3.bf16.msra.mxu1 %v2422_v49  ;;  %2150 = vmatprep.subr.bf16.mxu0 %v2423_v50  ;;  %v1955_v49 = vcombine.high %v301_v45, %v301_v45  ;;  %v2483_v50 = vld [vmem:[#allocation5 + $0x340] sm:$0xff]  }
  0xc8   : > { %2172 = vmatprep.subr.bf16.mxu1 %v2424_v51  ;;  %v2484_v51 = vld [vmem:[#allocation5 + $0x300] sm:$0xff]  }
  0xca   : > { %2151 = vmatpush3.bf16.msra.mxu0 %v2425_v52  ;;  %v2485_v52 = vld [vmem:[#allocation5 + $0x380] sm:$0xff]  }
  0xcb   : > { %2173 = vmatpush3.bf16.msra.mxu1 %v2426_v53  ;;  %2152 = vmatprep.subr.bf16.mxu0 %v2427_v54  ;;  %v2486_v53 = vld [vmem:[#allocation5 + $0x348] sm:$0xff]   ;;  %v2749_v54 = vmov 0  }
  0xcc   : > { %2174 = vmatprep.subr.bf16.mxu1 %v2428_v55  ;;  %v2487_v55 = vld [vmem:[#allocation5 + $0x308] sm:$0xff]  }
  0xce   : > { %2153 = vmatpush3.bf16.msra.mxu0 %v2429_v56  ;;  %v2488_v56 = vld [vmem:[#allocation5 + $0x388] sm:$0xff]  }
  0xcf   : > { %2175 = vmatpush3.bf16.msra.mxu1 %v2430_v57  ;;  %2154 = vmatprep.subr.bf16.mxu0 %v2431_v58  ;;  %v2489_v57 = vld [vmem:[#allocation5 + $0x350] sm:$0xff]  }
  0xd0   : > { %2176 = vmatprep.subr.bf16.mxu1 %v2432_v59  ;;  %v2490_v58 = vld [vmem:[#allocation5 + $0x310] sm:$0xff]  }
  0xd1   : > { %v2491_v59 = vld [vmem:[#allocation5 + $0x390] sm:$0xff]  }
  0xd2   : > { %2155 = vmatpush3.bf16.msra.mxu0 %v2433_v60  ;;  %v2492_v60 = vld [vmem:[#allocation5 + $0x358] sm:$0xff]  }
  0xd3   : > { %2177 = vmatpush3.bf16.msra.mxu1 %v2434_v61  ;;  %2156 = vmatprep.subr.bf16.mxu0 %v2435_v62  ;;  %v2493_v61 = vld [vmem:[#allocation5 + $0x318] sm:$0xff]  }
  0xd4   : > { %2178 = vmatprep.subr.bf16.mxu1 %v2436_v63  ;;  %v2494_v62 = vld [vmem:[#allocation5 + $0x398] sm:$0xff]   ;;  %v2495_v63 = vld [vmem:[#allocation5 + $0x360] sm:$0xff]  }
  0xd6   : > { %2157 = vmatpush3.bf16.msra.mxu0 %v2437_v0  ;;  %v2496_v0 = vld [vmem:[#allocation5 + $0x320] sm:$0xff]  }
  0xd7   : > { %2179 = vmatpush3.bf16.msra.mxu1 %v2438_v1  ;;  %2158 = vmatprep.subr.bf16.mxu0 %v2439_v2  ;;  %v2497_v1 = vld [vmem:[#allocation5 + $0x3a0] sm:$0xff]   ;;  %v2498_v2 = vld [vmem:[#allocation5 + $0x368] sm:$0xff]  }
  0xd8   : > { %2180 = vmatprep.subr.bf16.mxu1 %v2440_v3  ;;  %v2499_v3 = vld [vmem:[#allocation5 + $0x328] sm:$0xff]  }
  0xda   : > { %2159 = vmatpush3.bf16.msra.mxu0 %v2441_v4  ;;  %v2500_v4 = vld [vmem:[#allocation5 + $0x3a8] sm:$0xff]  }
  0xdb   : > { %2181 = vmatpush3.bf16.msra.mxu1 %v2442_v5  ;;  %2188 = vmatprep.subr.bf16.mxu0 %v2447_v12  ;;  %v2501_v5 = vld [vmem:[#allocation5 + $0x370] sm:$0xff]   ;;  %v2506_v12 = vld [vmem:[#allocation5 + $0x3b8] sm:$0xff]  }
  0xdc   : > { %2210 = vmatprep.subr.bf16.mxu1 %v2448_v13  ;;  %v303_v13 = vld [vmem:[%s3003_s13 + $0x38] sm:$0xff] }
  0xdd   : > { %1483 = vmatmul.mubr.bf16.vlgmr.msra.gmra.mrb[4].mxu0 %v1948_v7  ;;  %v302_v7 = vld [vmem:[%s3003_s13 + $0x30] sm:$0xff] }
  0xde   : > { %1523 = vmatmul.mubr.bf16.vlgmr.msra.gmra.mrb[4].mxu1 %v1950_v10  ;;  %2189 = vmatpush3.bf16.msra.mxu0 %v2449_v14  ;;  %v1957_v9 = vcombine.high %v302_v7, %v302_v7  ;;  %v2504_v10 = vld [vmem:[#allocation5 + $0x378] sm:$0xff]   ;;  %v1959_v14 = vcombine.high %v303_v13, %v303_v13 }
  0xdf   : > { %2211 = vmatpush3.bf16.msra.mxu1 %v2450_v15  ;;  %2190 = vmatprep.subr.bf16.mxu0 %v2451_v16  ;;  %v2509_v15 = vld [vmem:[#allocation5 + $0x3c0] sm:$0xff]   ;;  %v1956_v16 = vcombine.low %v302_v7, %v302_v7 }
  0xe0   : > { %2212 = vmatprep.subr.bf16.mxu1 %v2452_v17  ;;  %1562 = vmatprep.mubr.bf16.mxu0 %v1953_v47  ;;  %v2510_v17 = vld [vmem:[#allocation5 + $0x3c8] sm:$0xff]  }
  0xe1   : > { %1602 = vmatprep.mubr.bf16.mxu1 %v1955_v49 }
  0xe2   : > { %2191 = vmatpush3.bf16.msra.mxu0 %v2453_v18  ;;  %v2511_v18 = vld [vmem:[#allocation5 + $0x3d0] sm:$0xff]  }
  0xe3   : > { %2213 = vmatpush3.bf16.msra.mxu1 %v2454_v19  ;;  %2192 = vmatprep.subr.bf16.mxu0 %v2455_v20  ;;  %v2512_v19 = vld [vmem:[#allocation5 + $0x3d8] sm:$0xff]   ;;  %v2513_v20 = vld [vmem:[#allocation5 + $0x3e0] sm:$0xff]  }
  0xe4   : > { %2214 = vmatprep.subr.bf16.mxu1 %v2456_v21  ;;  %v1958_v21 = vcombine.low %v303_v13, %v303_v13 }
  0xe6   : > { %2193 = vmatpush3.bf16.msra.mxu0 %v2457_v22  ;;  %v2516_v22 = vld [vmem:[#allocation8] sm:$0xff]  }
  0xe7   : > { %2215 = vmatpush3.bf16.msra.mxu1 %v2458_v23  ;;  %2194 = vmatprep.subr.bf16.mxu0 %v2459_v24  ;;  %v2750_v23 = vmov 0.0   ;;  %v2517_v24 = vld [vmem:[#allocation8 + $0x8] sm:$0xff]  }
  0xe8   : > { %2216 = vmatprep.subr.bf16.mxu1 %v2460_v25  ;;  %v2518_v25 = vld [vmem:[#allocation8 + $0x10] sm:$0xff]  }
  0xea   : > { %2195 = vmatpush3.bf16.msra.mxu0 %v2461_v26  ;;  %v2519_v26 = vld [vmem:[#allocation8 + $0x18] sm:$0xff]  }
  0xeb   : > { %2217 = vmatpush3.bf16.msra.mxu1 %v2462_v27  ;;  %2196 = vmatprep.subr.bf16.mxu0 %v2463_v28  ;;  %v2520_v27 = vld [vmem:[#allocation8 + $0x20] sm:$0xff]   ;;  %v2521_v28 = vld [vmem:[#allocation8 + $0x28] sm:$0xff]  }
  0xec   : > { %2218 = vmatprep.subr.bf16.mxu1 %v2464_v29  ;;  %v2522_v29 = vld [vmem:[#allocation8 + $0x30] sm:$0xff]  }
  0xee   : > { %2197 = vmatpush3.bf16.msra.mxu0 %v2465_v30  ;;  %v2523_v30 = vld [vmem:[#allocation8 + $0x38] sm:$0xff]  }
  0xef   : > { %2219 = vmatpush3.bf16.msra.mxu1 %v2466_v31  ;;  %2198 = vmatprep.subr.bf16.mxu0 %v2467_v32 }
  0xf0   : > { %2220 = vmatprep.subr.bf16.mxu1 %v2468_v33  ;;  %v1943_v33 = vld [vmem:[#allocation7] ss:$0 sm:$0xff] }
  0xf2   : > { %2199 = vmatpush3.bf16.msra.mxu0 %v2469_v34 }
  0xf3   : > { %2221 = vmatpush3.bf16.msra.mxu1 %v2470_v35  ;;  %2200 = vmatprep.subr.bf16.mxu0 %v2471_v36 }
  0xf4   : > { %2222 = vmatprep.subr.bf16.mxu1 %v2472_v37 }
  0xf6   : > { %2201 = vmatpush3.bf16.msra.mxu0 %v2473_v38 }
  0xf7   : > { %2223 = vmatpush3.bf16.msra.mxu1 %v2474_v39  ;;  %2202 = vmatprep.subr.bf16.mxu0 %v2475_v40 }
  0xf8   : > { %2224 = vmatprep.subr.bf16.mxu1 %v2476_v41 }
  0xfa   : > { %2203 = vmatpush3.bf16.msra.mxu0 %v2477_v42 }
  0xfb   : > { %2225 = vmatpush3.bf16.msra.mxu1 %v2478_v43  ;;  %2232 = vmatprep.subr.bf16.mxu0 %v2483_v50 }
  0xfc   : > { %1650 = vmatprep.subr.bf16.mxu1 %v2749_v54 }
  0xfd   : > { %1563 = vmatmul.mubr.bf16.vlgmr.msra.gmra.mrb[8].mxu0 %v1952_v46 }
  0xfe   : > { %1603 = vmatmul.mubr.bf16.vlgmr.msra.gmra.mrb[8].mxu1 %v1954_v48  ;;  %2233 = vmatpush3.bf16.msra.mxu0 %v2484_v51 }
  0xff   : > { %1651 = vmatpush1.bf16.msra.mxu1 %v2485_v52  ;;  %2234 = vmatprep.subr.bf16.mxu0 %v2486_v53 }
 0x100   : > { %1652 = vmatprep.subr.bf16.mxu1 %v2749_v54  ;;  %1642 = vmatprep.mubr.bf16.mxu0 %v1957_v9 }
 0x101   : > { %2085 = vmatprep.mubr.msk.bf16.mxu1 %vm1366_vm0, %v1959_v14 }
 0x102   : > { %2235 = vmatpush3.bf16.msra.mxu0 %v2487_v55 }
 0x103   : > { %1653 = vmatpush1.bf16.msra.mxu1 %v2488_v56  ;;  %2236 = vmatprep.subr.bf16.mxu0 %v2489_v57 }
 0x104   : > { %1654 = vmatprep.subr.bf16.mxu1 %v2749_v54 }
 0x106   : > { %2237 = vmatpush3.bf16.msra.mxu0 %v2490_v58 }
 0x107   : > { %1655 = vmatpush1.bf16.msra.mxu1 %v2491_v59  ;;  %2238 = vmatprep.subr.bf16.mxu0 %v2492_v60 }
 0x108   : > { %1656 = vmatprep.subr.bf16.mxu1 %v2749_v54 }
 0x10a   : > { %2239 = vmatpush3.bf16.msra.mxu0 %v2493_v61 }
 0x10b   : > { %1657 = vmatpush1.bf16.msra.mxu1 %v2494_v62  ;;  %2240 = vmatprep.subr.bf16.mxu0 %v2495_v63 }
 0x10c   : > { %1658 = vmatprep.subr.bf16.mxu1 %v2749_v54 }
 0x10e   : > { %2241 = vmatpush3.bf16.msra.mxu0 %v2496_v0 }
 0x10f   : > { %1659 = vmatpush1.bf16.msra.mxu1 %v2497_v1  ;;  %2242 = vmatprep.subr.bf16.mxu0 %v2498_v2 }
 0x110   : > { %1660 = vmatprep.subr.bf16.mxu1 %v2749_v54 }
 0x112   : > { %2243 = vmatpush3.bf16.msra.mxu0 %v2499_v3 }
 0x113   : > { %1661 = vmatpush1.bf16.msra.mxu1 %v2500_v4  ;;  %2244 = vmatprep.subr.bf16.mxu0 %v2501_v5 }
 0x114   : > { %1662 = vmatprep.subr.bf16.mxu1 %v2749_v54 }
 0x116   : > { %2245 = vmatpush3.bf16.msra.mxu0 %v2502_v6 }
 0x117   : > { %1663 = vmatpush1.bf16.msra.mxu1 %v2503_v8  ;;  %2246 = vmatprep.subr.bf16.mxu0 %v2504_v10 }
 0x118   : > { %1664 = vmatprep.subr.bf16.mxu1 %v2749_v54 }
 0x11a   : > { %2247 = vmatpush3.bf16.msra.mxu0 %v2505_v11 }
 0x11b   : > { %1665 = vmatpush1.bf16.msra.mxu1 %v2506_v12  ;;  %2263 = vmatprep.subr.bf16.mxu0 %v2750_v23 }
 0x11c   : > { %1666 = vmatprep.subr.bf16.mxu1 %v2749_v54 }
 0x11d   : > { %1643 = vmatmul.mubr.bf16.vlgmr.msra.gmra.mrb[12].mxu0 %v1956_v16 }
 0x11e   : > { %2264 = vmatpush3.bf16.msra.mxu0 %v2516_v22  ;;  %2279 = vmatprep.mubr.msk.bf16.mxu0 %vm2751_vm1, %v2750_v23 }
 0x11f   : > { %1667 = vmatpush1.bf16.msra.mxu1 %v2509_v15  ;;  %2265 = vmatprep.subr.bf16.mxu0 %v2750_v23 }
 0x120   : > { %1668 = vmatprep.subr.bf16.mxu1 %v2749_v54 }
 0x122   : > { %2266 = vmatpush3.bf16.msra.mxu0 %v2517_v24 }
 0x123   : > { %1669 = vmatpush1.bf16.msra.mxu1 %v2510_v17  ;;  %2267 = vmatprep.subr.bf16.mxu0 %v2750_v23  ;;  %v2086_v17 = vld [vmem:[#allocation10] ss:$0 sm:$0xff] }
 0x124   : > { %1670 = vmatprep.subr.bf16.mxu1 %v2749_v54 }
 0x126   : > { %2268 = vmatpush3.bf16.msra.mxu0 %v2518_v25 }
 0x127   : > { %1671 = vmatpush1.bf16.msra.mxu1 %v2511_v18  ;;  %2269 = vmatprep.subr.bf16.mxu0 %v2750_v23 }
 0x128   : > { %1672 = vmatprep.subr.bf16.mxu1 %v2749_v54 }
 0x12a   : > { %2270 = vmatpush3.bf16.msra.mxu0 %v2519_v26 }
 0x12b   : > { %1673 = vmatpush1.bf16.msra.mxu1 %v2512_v19  ;;  %2271 = vmatprep.subr.bf16.mxu0 %v2750_v23 }
 0x12c   : > { %1674 = vmatprep.subr.bf16.mxu1 %v2749_v54 }
 0x12e   : > { %2272 = vmatpush3.bf16.msra.mxu0 %v2520_v27 }
 0x12f   : > { %1675 = vmatpush1.bf16.msra.mxu1 %v2513_v20  ;;  %2273 = vmatprep.subr.bf16.mxu0 %v2750_v23 }
 0x132   : > { %1683 = vmatmul.mubr.bf16.vlgmr.msra.gmra.mrb[12].mxu1 %v1958_v21  ;;  %2274 = vmatpush3.bf16.msra.mxu0 %v2521_v28 }
 0x133   : > { %2275 = vmatprep.subr.bf16.mxu0 %v2750_v23 }
 0x136   : > { %2276 = vmatpush3.bf16.msra.mxu0 %v2522_v29 }
 0x137   : > { %2277 = vmatprep.subr.bf16.mxu0 %v2750_v23 }
 0x13a   : > { %2278 = vmatpush3.bf16.msra.mxu0 %v2523_v30 }
 0x190   : > { %v2116_v31 = vpop.f32.mrb[0].mxu0 }
 0x191   : > { %v2138_v32 = vpop.f32.mrb[0].mxu1  ;;  %v2117_v34 = vpop.f32.mrb[1].mxu0 }
 0x192   : > { %v2139_v35 = vpop.f32.mrb[1].mxu1  ;;  %v2118_v36 = vadd.f32 %v2117_v34, %v2116_v31  ;;  %v2119_v39 = vpop.f32.mrb[2].mxu0 }
 0x193   : > { %v2140_v37 = vadd.f32 %v2139_v35, %v2138_v32  ;;  %v2141_v38 = vpop.f32.mrb[2].mxu1  ;;  %v2120_v41 = vpop.f32.mrb[3].mxu0 }
 0x194   : > { %v2142_v40 = vpop.f32.mrb[3].mxu1  ;;  %v1405_v42 = vadd.f32 %v2118_v36, %v1943_v33 }
 0x196   : > { %v1445_v43 = vadd.f32 %v2140_v37, %v1405_v42 }
 0x1b0   : > { %v2160_v44 = vpop.f32.mrb[4].mxu0 }
 0x1b1   : > { %v2182_v45 = vpop.f32.mrb[4].mxu1  ;;  %v2161_v46 = vpop.f32.mrb[5].mxu0 }
 0x1b2   : > { %v2183_v47 = vpop.f32.mrb[5].mxu1  ;;  %v2162_v48 = vadd.f32 %v2161_v46, %v2160_v44  ;;  %v2163_v51 = vpop.f32.mrb[6].mxu0 }
 0x1b3   : > { %v2184_v49 = vadd.f32 %v2183_v47, %v2182_v45  ;;  %v2185_v50 = vpop.f32.mrb[6].mxu1  ;;  %v2164_v53 = vpop.f32.mrb[7].mxu0 }
 0x1b4   : > { %v2186_v52 = vpop.f32.mrb[7].mxu1  ;;  %v1485_v54 = vadd.f32 %v2162_v48, %v1445_v43 }
 0x1b6   : > { %v1525_v55 = vadd.f32 %v2184_v49, %v1485_v54 }
 0x1d0   : > { %v2204_v56 = vpop.f32.mrb[8].mxu0 }
 0x1d1   : > { %v2226_v57 = vpop.f32.mrb[8].mxu1  ;;  %v2205_v58 = vpop.f32.mrb[9].mxu0 }
 0x1d2   : > { %v2206_v59 = vadd.f32 %v2205_v58, %v2204_v56  ;;  %v2227_v60 = vpop.f32.mrb[9].mxu1  ;;  %v2207_v61 = vpop.f32.mrb[10].mxu0 }
 0x1d3   : > { %v2228_v62 = vadd.f32 %v2227_v60, %v2226_v57  ;;  %v2229_v63 = vpop.f32.mrb[10].mxu1  ;;  %v2208_v0 = vpop.f32.mrb[11].mxu0 }
 0x1d4   : > { %v1565_v1 = vadd.f32 %v2206_v59, %v1525_v55  ;;  %v2230_v2 = vpop.f32.mrb[11].mxu1 }
 0x1d6   : > { %v1605_v3 = vadd.f32 %v2228_v62, %v1565_v1 }
 0x1f0   : > { %v2248_v4 = vpop.f32.mrb[12].mxu0 }
 0x1f1   : > { %v2249_v5 = vpop.f32.mrb[13].mxu0 }
 0x1f2   : > { %v2250_v6 = vadd.f32 %v2249_v5, %v2248_v4  ;;  %v2251_v7 = vpop.f32.mrb[14].mxu0 }
 0x1f3   : > { %v2252_v8 = vpop.f32.mrb[15].mxu0 }
 0x1f4   : > { %v1645_v9 = vadd.f32 %v2250_v6, %v1605_v3 }
 0x205   : > { %v1684_v10 = vpop.f32.mrb[12].mxu1 }
 0x206   : > { %v1685_v11 = vadd.f32 %v1684_v10, %v1645_v9  ;;  %v1686_v12 = vpop.f32.mrb[13].mxu1 }
 0x207   : > { %v1687_v13 = vpop.f32.mrb[14].mxu1 }
 0x208   : > { %v1690_v14 = vmax.f32 %v1685_v11, 0.0  ;;  %v1688_v15 = vpop.f32.mrb[15].mxu1 }
 0x20a   : > { %v1691_v16 = vpack.c.bf16 %v1690_v14, %v1690_v14 }
 0x20c   : > { %2280 = vmatmul.mubr.bf16.vlgmr.msra.gmra.mrb[16].mxu0 %v1691_v16 }
 0x2df   : > { %v1797_v18 = vpop.f32.mrb[16].mxu0 }
 0x2e0   : > { %v1798_v19 = vadd.f32 %v2086_v17, %v1797_v18  ;;  %v2281_v20 = vpop.f32.mrb[17].mxu0 }
 0x2e1   : > { %v1800_v21 = vpop.f32.mrb[18].mxu0 }
 0x2e2   : > { %1803 = vst [vmem:[%s294_s26] sm:$0xff] %v1798_v19  ;;  %v2282_v22 = vpop.f32.mrb[19].mxu0 }
 0x2e3   : > { %2679 = shalt.err (!%p2676_p0)
}
 0x2e4   : > { %s2680_s30 = scalar_lea.hbm %s3043_s8, 128  ;;  %s2684_s15 = scalar_lea.hbm %s3091_s5, 384 }
 0x2e5   : > { %p2681_p2 = scmp.ne.s32.totalorder %s3043_s8, %s2680_s30  ;;  %p2685_p10 = scmp.lt.u32.totalorder %s3043_s8, %s3091_s5 }
 0x2e6   : > { %p2686_p11 = scmp.lt.u32.totalorder %s2684_s15, %s2680_s30  ;;  %p2688_p5 = scmp.lt.u32.totalorder %s2680_s30, %s3043_s8 }
 0x2e7   : > { %p2682_p7 = pnand %p2681_p2, %p3109_p4 }
 0x2e8   : > { %p2687_p1 = por %p2686_p11, %p2685_p10 }
 0x2e9   : > { %p2683_p9 = pneg %p2682_p7 }
 0x2ea   : > { %p2689_p6 = por %p2688_p5, %p2687_p1 }
 0x2ec   : > { %p2690_p8 = pnand %p2689_p6, %p2683_p9 }
 0x2ee   : > { %2693 = shalt.err (!%p2690_p8)
}
 0x2ef   : > { %2301 = dma.vmem_to_hbm [thread:$0]  (%p3109_p4), %s3045_s29, 128, %s3043_s8, %s1805_s14  }
 0x2f0 PF: > { %p2333_p12 = scmp.ge.s32.totalorder %s2740_s21, 2  ;;  %s1830_s9 = sand.u32 1, %s2728_s18  }
 0x2f1   : > { %p3110_p3 = scmp.ne.s32.totalorder %s3102_s12, 0  ;;  %s1831_s26 = scalar_lea.sflag [#allocation4], %s1830_s9 }
 0x2f3   : > { %p2321_p13 = pnand %p2333_p12, %p3110_p3 }
 0x2f5   : > { %2723 = dma.done.wait (!%p2321_p13), %s1831_s26, 128  }
 0x2f6   : > { %2725 = vsyncadd (!%p2321_p13), %s1831_s26, 4294967168  ;;  %p20_p0 = scmp.ge.s32.totalorder %s2923_s28, 5   ;;  %s3111_s18 = smov %s2732_s19 }
 0x2f7   : > { %s3112_s19 = smov %s2736_s20  ;;  %s3113_s20 = smov %s2934_s16 }
 0x2f8   : > { %s3114_s21 = smov %s2923_s28  ;;  %22 = sbr.rel (!%p20_p0) target bundleno = 7 (0x7), region = 101 }
 0x2ff   :  { %1836 = vsyncpa [#allocation3], 1 }
 0x300   :  { %1838 = vsyncpa [#allocation3 + $0x1], 1 }
 0x301   :  { %1839 = vsyncpa [#allocation6], 1 }
 0x302   :  { %1840 = vsyncpa [#allocation9], 1 }
 0x303   :  { %1841 = vsyncpa [#allocation4], 1 }
 0x304   :  { %1843 = vsyncpa [#allocation4 + $0x1], 1 }

</bundles_post_ra>
